<compile_context>
chip_gen: v7x
topology: tpu7x:2x2x1
jax: 0.10.0
libtpu: 0.0.40
codegen_flags: <defaults>
</compile_context>

<pallas_src>
import math

import jax
import jax.numpy as jnp
from jax.experimental import pallas as pl
from jax.experimental.pallas import tpu as pltpu

_LANE = 128
_MiB = 1024 * 1024


def _cdiv(a, b):
    return (a + b - 1) // b


def _tpu_vmem_limit_bytes():
    """Generation-aware scoped-VMEM limit to request (with headroom)."""
    phys = None
    try:
        info = pltpu.get_tpu_info()
        phys = getattr(info, "vmem_capacity_bytes", None)
    except Exception:
        phys = None
    if phys is None:
        return 32 * _MiB          # unknown chip: safe on v5e / v6e / v7x
    if phys <= 64 * _MiB:
        return 48 * _MiB          # v7x-class: 64 MiB physical per TC
    return 64 * _MiB              # v5e / v6e: 128 MiB physical


def _row_block_spec(tm, d):
    # Helper avoids the late-binding-lambda trap when built in a loop.
    return pl.BlockSpec((tm, d), lambda r: (r, 0))


def _make_slab_copy_kernel(offsets, sizes):
    """Copy each input row-tile into its static column slab of the output."""

    def kernel(*refs):
        *in_refs, out_ref = refs
        for in_ref, off, sz in zip(in_refs, offsets, sizes):
            out_ref[:, off:off + sz] = in_ref[...]

    return kernel


def _make_hbm_dma_kernel(offsets, sizes):
    """HBM->HBM: one strided DMA per input into its output column slab."""
    n = len(sizes)

    def kernel(*refs):
        in_refs = refs[:n]
        out_ref = refs[n]
        sems = refs[n + 1]
        copies = []
        for i, (in_ref, off, sz) in enumerate(zip(in_refs, offsets, sizes)):
            cp = pltpu.make_async_copy(
                in_ref, out_ref.at[:, off:off + sz], sems.at[i])
            cp.start()
            copies.append(cp)
        for cp in copies:
            cp.wait()

    return kernel


def catter(xs, *, max_row_tile=2048, small_bytes_threshold=2 * _MiB,
           allow_hbm_dma=True):
    """Concatenate a list/tuple of arrays along the last dim (torch.cat dim=-1)."""
    xs = list(xs)
    assert len(xs) >= 1, "need at least one input"
    lead = xs[0].shape[:-1]
    for x in xs:
        assert x.shape[:-1] == lead, "leading dims must match for cat(dim=-1)"

    # torch.cat promotes mixed dtypes; mirror that in the wrapper.
    dtype = jnp.result_type(*[x.dtype for x in xs])
    xs = [x.astype(dtype) for x in xs]

    # Zero-width inputs contribute nothing; drop them (avoids empty blocks).
    xs = [x for x in xs if x.shape[-1] > 0]
    if not xs:
        return jnp.zeros((*lead, 0), dtype=dtype)

    sizes = [int(x.shape[-1]) for x in xs]
    offsets, acc = [], 0
    for s in sizes:
        offsets.append(acc)
        acc += s
    total = acc

    M = math.prod(lead) if lead else 1
    itemsize = jnp.dtype(dtype).itemsize
    total_bytes = M * total * itemsize

    # Small-problem fast path: pallas_call / pipeline startup dominates tiny
    # copies; XLA's native concat wins there.
    if M == 0 or total_bytes < small_bytes_threshold:
        return jnp.concatenate(xs, axis=-1)

    # Flatten leading dims -> 2D (M, D_i); tiling becomes a single row-grid.
    xs2 = [x.reshape(M, d) for x, d in zip(xs, sizes)]
    cost = pl.CostEstimate(flops=0, transcendentals=0,
                           bytes_accessed=2 * total_bytes)

    lane_aligned = (all(o % _LANE == 0 for o in offsets)
                    and all(s % _LANE == 0 for s in sizes))

    if allow_hbm_dma and lane_aligned:
        # --- Path 1: HBM->HBM strided DMA, no VMEM round trip. ---
        kernel = _make_hbm_dma_kernel(tuple(offsets), tuple(sizes))
        out2d = pl.pallas_call(
            kernel,
            out_shape=jax.ShapeDtypeStruct((M, total), dtype),
            in_specs=[pl.BlockSpec(memory_space=pl.ANY)] * len(xs2),
            out_specs=pl.BlockSpec(memory_space=pl.ANY),
            scratch_shapes=[pltpu.SemaphoreType.DMA((len(xs2),))],
            cost_estimate=cost,
        )(*xs2)
        return out2d.reshape(*lead, total)

    # --- Path 2: row-tiled VMEM slab copy (handles misaligned widths). ---
    vmem_limit = _tpu_vmem_limit_bytes()
    budget = int(vmem_limit * 0.8)        # budget matches the limit we request

    # Packed-sublane multiple: 8 for f32, 16 for bf16/f16, 32 for int8/fp8.
    mult = max(8, 8 * (4 // max(itemsize, 1)))

    # Working set ~ double-buffered inputs (sum = total) + double-buffered out.
    tm_cap = budget // (4 * total * itemsize)
    if tm_cap < 1:
        # TODO(synk): also tile the lane dimension for extremely wide concats;
        # fall back to XLA's native concat for that rare regime.
        return jnp.concatenate(xs, axis=-1)

    tm = min(M, max_row_tile, max(mult, tm_cap))
    if M > mult:
        # Guarantee >=2 grid steps so v7x's two TensorCores both get work.
        half = _cdiv(_cdiv(M, 2), mult) * mult
        tm = min(tm, half)
    if tm < M:
        tm = max(mult, (tm // mult) * mult)
    tm = min(tm, M)
    grid = (_cdiv(M, tm),)

    kernel = _make_slab_copy_kernel(tuple(offsets), tuple(sizes))
    in_specs = [_row_block_spec(tm, d) for d in sizes]
    out_spec = _row_block_spec(tm, total)

    out2d = pl.pallas_call(
        kernel,
        out_shape=jax.ShapeDtypeStruct((M, total), dtype),
        grid=grid,
        in_specs=in_specs,
        out_specs=out_spec,
        compiler_params=pltpu.CompilerParams(
            dimension_semantics=("parallel",),   # shard row tiles across TCs
            vmem_limit_bytes=vmem_limit,
        ),
        cost_estimate=cost,
    )(*xs2)
    return out2d.reshape(*lead, total)


if __name__ == "__main__":
    key = jax.random.PRNGKey(0)
    k1, k2, k3, k4, k5, k6 = jax.random.split(key, 6)

    # 1) Small CIN-readout-like case (per-dimension cochain features):
    #    hits the small-problem fast path.
    a = jax.random.normal(k1, (2, 8, 16), dtype=jnp.float32)
    b = jax.random.normal(k2, (2, 8, 32), dtype=jnp.float32)
    c = jax.random.normal(k3, (2, 8, 16), dtype=jnp.float32)
    out = jax.block_until_ready(catter([a, b, c]))
    ref = jnp.concatenate([a, b, c], axis=-1)
    assert out.shape == ref.shape and jnp.array_equal(out, ref), "small case"

    # 2) Lane-misaligned widths -> row-tiled VMEM slab-copy Pallas kernel.
    d = jax.random.normal(k4, (8, 128, 48), dtype=jnp.float32)
    e = jax.random.normal(k5, (8, 128, 80), dtype=jnp.float32)
    f = jax.random.normal(k6, (8, 128, 64), dtype=jnp.float32)
    out = jax.block_until_ready(catter([d, e, f], small_bytes_threshold=0))
    ref = jnp.concatenate([d, e, f], axis=-1)
    assert out.shape == ref.shape and jnp.array_equal(out, ref), "vmem path"

    # 3) 128-lane-aligned widths -> HBM->HBM strided-DMA Pallas kernel.
    g = jax.random.normal(k1, (4, 128, 128), dtype=jnp.float32)
    h = jax.random.normal(k2, (4, 128, 256), dtype=jnp.float32)
    i_ = jax.random.normal(k3, (4, 128, 128), dtype=jnp.float32)
    out = jax.block_until_ready(catter([g, h, i_], small_bytes_threshold=0))
    ref = jnp.concatenate([g, h, i_], axis=-1)
    assert out.shape == ref.shape and jnp.array_equal(out, ref), "dma path"

    print("KERNEL_OK")
</pallas_src>

<mosaic_0001>
module attributes {stable_mosaic.version = 11 : i64} {
  func.func @kernel(%arg0: i32, %arg1: memref<512x48xf32, #tpu.memory_space<vmem>>, %arg2: memref<512x80xf32, #tpu.memory_space<vmem>>, %arg3: memref<512x64xf32, #tpu.memory_space<vmem>>, %arg4: memref<512x192xf32, #tpu.memory_space<vmem>>) attributes {dimension_semantics = [#tpu.dimension_semantics<parallel>], iteration_bounds = array<i64: 2>, scalar_prefetch = 0 : i64, scratch_operands = 0 : i64, tpu.core_type = #tpu.core_type<tc>, window_params = [{transform_indices = @transform_0, window_bounds = array<i64: 512, 48>}, {transform_indices = @transform_1, window_bounds = array<i64: 512, 80>}, {transform_indices = @transform_2, window_bounds = array<i64: 512, 64>}, {transform_indices = @transform_3, window_bounds = array<i64: 512, 192>}]} {
    %c0 = arith.constant 0 : index
    %c0_0 = arith.constant 0 : index
    %0 = vector.load %arg1[%c0, %c0_0] : memref<512x48xf32, #tpu.memory_space<vmem>>, vector<512x48xf32>
    %c0_1 = arith.constant 0 : index
    %c0_2 = arith.constant 0 : index
    %1 = vector.load %arg4[%c0_1, %c0_2] : memref<512x192xf32, #tpu.memory_space<vmem>>, vector<512x48xf32>
    tpu.vector_store %arg4[%c0_1, %c0_2], %0 {strides = array<i32>} : memref<512x192xf32, #tpu.memory_space<vmem>>, vector<512x48xf32>,
    %c0_3 = arith.constant 0 : index
    %c0_4 = arith.constant 0 : index
    %2 = vector.load %arg2[%c0_3, %c0_4] : memref<512x80xf32, #tpu.memory_space<vmem>>, vector<512x80xf32>
    %c0_5 = arith.constant 0 : index
    %c48 = arith.constant 48 : index
    %3 = vector.load %arg4[%c0_5, %c48] : memref<512x192xf32, #tpu.memory_space<vmem>>, vector<512x80xf32>
    tpu.vector_store %arg4[%c0_5, %c48], %2 {strides = array<i32>} : memref<512x192xf32, #tpu.memory_space<vmem>>, vector<512x80xf32>,
    %c0_6 = arith.constant 0 : index
    %c0_7 = arith.constant 0 : index
    %4 = vector.load %arg3[%c0_6, %c0_7] : memref<512x64xf32, #tpu.memory_space<vmem>>, vector<512x64xf32>
    %c0_8 = arith.constant 0 : index
    %c128 = arith.constant 128 : index
    %5 = vector.load %arg4[%c0_8, %c128] : memref<512x192xf32, #tpu.memory_space<vmem>>, vector<512x64xf32>
    tpu.vector_store %arg4[%c0_8, %c128], %4 {strides = array<i32>} : memref<512x192xf32, #tpu.memory_space<vmem>>, vector<512x64xf32>,
    return
  }
  func.func @transform_0(%arg0: i32) -> (i32, i32) {
    %c0_i32 = arith.constant 0 : i32
    %c0_i32_0 = arith.constant 0 : i32
    return %arg0, %c0_i32 : i32, i32
  }
  func.func @transform_1(%arg0: i32) -> (i32, i32) {
    %c0_i32 = arith.constant 0 : i32
    %c0_i32_0 = arith.constant 0 : i32
    return %arg0, %c0_i32 : i32, i32
  }
  func.func @transform_2(%arg0: i32) -> (i32, i32) {
    %c0_i32 = arith.constant 0 : i32
    %c0_i32_0 = arith.constant 0 : i32
    return %arg0, %c0_i32 : i32, i32
  }
  func.func @transform_3(%arg0: i32) -> (i32, i32) {
    %c0_i32 = arith.constant 0 : i32
    %c0_i32_0 = arith.constant 0 : i32
    return %arg0, %c0_i32 : i32, i32
  }
}

</mosaic_0001>

<bundles_post_ra>
// kernel: tpu_custom_call.1
= control target key start
LH: loop header
LB: loop body
LE: loop exit
PB: predicated region body
PF: predicated region fallthrough
CT: control target
= control target key end

     0   :  { %s1000_s12 = smov 0   ;;  %s1676_s0 = inlined_call_operand.vmem [shape: f32[1024,48], index: 0, kind: input, shape index: {}]   ;;  %s1677_s1 = inlined_call_operand.vmem [shape: f32[1024,80], index: 1, kind: input, shape index: {}]   ;;  %s1678_s2 = inlined_call_operand.vmem [shape: f32[1024,64], index: 2, kind: input, shape index: {}]   ;;  %s1679_s3 = inlined_call_operand.vmem [shape: f32[1024,192], index: 3, kind: output, shape index: {}]  }
   0x1 LB: > { %s945_s13 = sadd.s32 4294967295, %s977_s12   ;;  %p949_p0 = scmp.ge.s32.totalorder %s977_s12, 1  ;;  %s977_s12 = sphi %s1000_s12, %s13_s12  }
   0x2   : > { %p160_p1 = scmp.lt.s32.totalorder %s977_s12, 3 }
   0x4   : > { %p161_p2 = pnand %p949_p0, %p160_p1 }
   0x5   : > { %s950_s14 = sshll.u32 (!%p161_p2), %s945_s13, 6  ;;  %vm798_vm0 = vcmask (!%p161_p2), 523264   ;;  %s979_s26 = smov (!%p161_p2), 48   ;;  %vm284_vm1 = vcmask (!%p161_p2), 392192   ;;  %vm669_vm2 = vcmask (!%p161_p2), 1047936  }
   0x6   : > { %164 = sbr.rel (%p161_p2) target bundleno = 288 (0x120), region = 32  ;;  %p196_p3 = scmp.lt.s32.totalorder (!%p161_p2), %s950_s14, 127 }
   0xd   : > { %s1681_s14 = smov (!%p196_p3, %s950_s14), 127 }
   0xe   : > { %s1008_s15 = sshll.u32 %s1681_s14, 3  ;;  %s961_s16 = sshll.u32 %s1681_s14, 4 }
   0xf   : > { %s1014_s19 = scalar_lea.vmem %s1677_s1, %s1008_s15  ;;  %s1020_s22 = scalar_lea.vmem %s1678_s2, %s1008_s15 }
  0x10   : > { %s1025_s25 = scalar_lea.vmem %s1679_s3, %s961_s16  ;;  %v351_v0 = vld [vmem:[%s1014_s19 + $0x10] sm:$0xff]  ;;  %v734_v1 = vld [vmem:[%s1020_s22] sm:$0xff]  ;;  %v735_v2 = vld [vmem:[%s1020_s22 + $0x8] sm:$0xff]  ;;  %s1243_s29 = scalar_lea.vmem %s1676_s0, %s1008_s15 }
  0x11   : > { %v736_v3 = vld [vmem:[%s1020_s22 + $0x10] sm:$0xff]  ;;  %v737_v4 = vld [vmem:[%s1020_s22 + $0x18] sm:$0xff]  ;;  %v738_v5 = vld [vmem:[%s1020_s22 + $0x20] sm:$0xff]  ;;  %799 = vst.msk [vmem:[%s1025_s25 + $0x8] sm:$0xff] %vm798_vm0, %v734_v1 }
  0x12   : > { %800 = vst.msk [vmem:[%s1025_s25 + $0x18] sm:$0xff] %vm798_vm0, %v735_v2  ;;  %481 = vrot.lane.b32.xlu1 %v351_v0, %s979_s26  ;;  %v739_v6 = vld [vmem:[%s1020_s22 + $0x28] sm:$0xff]  ;;  %v740_v7 = vld [vmem:[%s1020_s22 + $0x30] sm:$0xff] }
  0x13   : > { %v741_v8 = vld [vmem:[%s1020_s22 + $0x38] sm:$0xff]  ;;  %801 = vst.msk [vmem:[%s1025_s25 + $0x28] sm:$0xff] %vm798_vm0, %v736_v3  ;;  %802 = vst.msk [vmem:[%s1025_s25 + $0x38] sm:$0xff] %vm798_vm0, %v737_v4  ;;  %v742_v9 = vld [vmem:[%s1020_s22 + $0x40] sm:$0xff] }
  0x14   : > { %803 = vst.msk [vmem:[%s1025_s25 + $0x48] sm:$0xff] %vm798_vm0, %v738_v5  ;;  %v743_v10 = vld [vmem:[%s1020_s22 + $0x48] sm:$0xff]  ;;  %v744_v11 = vld [vmem:[%s1020_s22 + $0x50] sm:$0xff]  ;;  %804 = vst.msk [vmem:[%s1025_s25 + $0x58] sm:$0xff] %vm798_vm0, %v739_v6 }
  0x15   : > { %805 = vst.msk [vmem:[%s1025_s25 + $0x68] sm:$0xff] %vm798_vm0, %v740_v7  ;;  %806 = vst.msk [vmem:[%s1025_s25 + $0x78] sm:$0xff] %vm798_vm0, %v741_v8  ;;  %v745_v12 = vld [vmem:[%s1020_s22 + $0x58] sm:$0xff]  ;;  %v746_v13 = vld [vmem:[%s1020_s22 + $0x60] sm:$0xff] }
  0x16   : > { %v747_v14 = vld [vmem:[%s1020_s22 + $0x68] sm:$0xff]  ;;  %807 = vst.msk [vmem:[%s1025_s25 + $0x88] sm:$0xff] %vm798_vm0, %v742_v9  ;;  %808 = vst.msk [vmem:[%s1025_s25 + $0x98] sm:$0xff] %vm798_vm0, %v743_v10  ;;  %v748_v15 = vld [vmem:[%s1020_s22 + $0x70] sm:$0xff] }
  0x17   : > { %809 = vst.msk [vmem:[%s1025_s25 + $0xa8] sm:$0xff] %vm798_vm0, %v744_v11  ;;  %v749_v16 = vld [vmem:[%s1020_s22 + $0x78] sm:$0xff]  ;;  %v750_v17 = vld [vmem:[%s1020_s22 + $0x80] sm:$0xff]  ;;  %810 = vst.msk [vmem:[%s1025_s25 + $0xb8] sm:$0xff] %vm798_vm0, %v745_v12 }
  0x18   : > { %811 = vst.msk [vmem:[%s1025_s25 + $0xc8] sm:$0xff] %vm798_vm0, %v746_v13  ;;  %812 = vst.msk [vmem:[%s1025_s25 + $0xd8] sm:$0xff] %vm798_vm0, %v747_v14  ;;  %v751_v18 = vld [vmem:[%s1020_s22 + $0x88] sm:$0xff]  ;;  %v752_v19 = vld [vmem:[%s1020_s22 + $0x90] sm:$0xff] }
  0x19   : > { %v753_v20 = vld [vmem:[%s1020_s22 + $0x98] sm:$0xff]  ;;  %813 = vst.msk [vmem:[%s1025_s25 + $0xe8] sm:$0xff] %vm798_vm0, %v748_v15  ;;  %814 = vst.msk [vmem:[%s1025_s25 + $0xf8] sm:$0xff] %vm798_vm0, %v749_v16  ;;  %v754_v21 = vld [vmem:[%s1020_s22 + $0xa0] sm:$0xff] }
  0x1a   : > { %815 = vst.msk [vmem:[%s1025_s25 + $0x108] sm:$0xff] %vm798_vm0, %v750_v17  ;;  %v755_v22 = vld [vmem:[%s1020_s22 + $0xa8] sm:$0xff]  ;;  %v756_v23 = vld [vmem:[%s1020_s22 + $0xb0] sm:$0xff]  ;;  %816 = vst.msk [vmem:[%s1025_s25 + $0x118] sm:$0xff] %vm798_vm0, %v751_v18 }
  0x1b   : > { %817 = vst.msk [vmem:[%s1025_s25 + $0x128] sm:$0xff] %vm798_vm0, %v752_v19  ;;  %818 = vst.msk [vmem:[%s1025_s25 + $0x138] sm:$0xff] %vm798_vm0, %v753_v20  ;;  %v757_v24 = vld [vmem:[%s1020_s22 + $0xb8] sm:$0xff]  ;;  %v758_v25 = vld [vmem:[%s1020_s22 + $0xc0] sm:$0xff] }
  0x1c   : > { %v759_v26 = vld [vmem:[%s1020_s22 + $0xc8] sm:$0xff]  ;;  %819 = vst.msk [vmem:[%s1025_s25 + $0x148] sm:$0xff] %vm798_vm0, %v754_v21  ;;  %820 = vst.msk [vmem:[%s1025_s25 + $0x158] sm:$0xff] %vm798_vm0, %v755_v22  ;;  %v760_v27 = vld [vmem:[%s1020_s22 + $0xd0] sm:$0xff] }
  0x1d   : > { %821 = vst.msk [vmem:[%s1025_s25 + $0x168] sm:$0xff] %vm798_vm0, %v756_v23  ;;  %v761_v28 = vld [vmem:[%s1020_s22 + $0xd8] sm:$0xff]  ;;  %v762_v29 = vld [vmem:[%s1020_s22 + $0xe0] sm:$0xff]  ;;  %822 = vst.msk [vmem:[%s1025_s25 + $0x178] sm:$0xff] %vm798_vm0, %v757_v24 }
  0x1e   : > { %823 = vst.msk [vmem:[%s1025_s25 + $0x188] sm:$0xff] %vm798_vm0, %v758_v25  ;;  %824 = vst.msk [vmem:[%s1025_s25 + $0x198] sm:$0xff] %vm798_vm0, %v759_v26  ;;  %v763_v30 = vld [vmem:[%s1020_s22 + $0xe8] sm:$0xff]  ;;  %v764_v31 = vld [vmem:[%s1020_s22 + $0xf0] sm:$0xff] }
  0x1f   : > { %v765_v32 = vld [vmem:[%s1020_s22 + $0xf8] sm:$0xff]  ;;  %825 = vst.msk [vmem:[%s1025_s25 + $0x1a8] sm:$0xff] %vm798_vm0, %v760_v27  ;;  %826 = vst.msk [vmem:[%s1025_s25 + $0x1b8] sm:$0xff] %vm798_vm0, %v761_v28  ;;  %v766_v33 = vld [vmem:[%s1020_s22 + $0x100] sm:$0xff] }
  0x20   : > { %827 = vst.msk [vmem:[%s1025_s25 + $0x1c8] sm:$0xff] %vm798_vm0, %v762_v29  ;;  %v767_v34 = vld [vmem:[%s1020_s22 + $0x108] sm:$0xff]  ;;  %v768_v35 = vld [vmem:[%s1020_s22 + $0x110] sm:$0xff]  ;;  %828 = vst.msk [vmem:[%s1025_s25 + $0x1d8] sm:$0xff] %vm798_vm0, %v763_v30 }
  0x21   : > { %829 = vst.msk [vmem:[%s1025_s25 + $0x1e8] sm:$0xff] %vm798_vm0, %v764_v31  ;;  %830 = vst.msk [vmem:[%s1025_s25 + $0x1f8] sm:$0xff] %vm798_vm0, %v765_v32  ;;  %v769_v36 = vld [vmem:[%s1020_s22 + $0x118] sm:$0xff]  ;;  %v770_v37 = vld [vmem:[%s1020_s22 + $0x120] sm:$0xff] }
  0x22   : > { %v771_v38 = vld [vmem:[%s1020_s22 + $0x128] sm:$0xff]  ;;  %831 = vst.msk [vmem:[%s1025_s25 + $0x208] sm:$0xff] %vm798_vm0, %v766_v33  ;;  %832 = vst.msk [vmem:[%s1025_s25 + $0x218] sm:$0xff] %vm798_vm0, %v767_v34  ;;  %v772_v39 = vld [vmem:[%s1020_s22 + $0x130] sm:$0xff] }
  0x23   : > { %833 = vst.msk [vmem:[%s1025_s25 + $0x228] sm:$0xff] %vm798_vm0, %v768_v35  ;;  %v773_v40 = vld [vmem:[%s1020_s22 + $0x138] sm:$0xff]  ;;  %v774_v41 = vld [vmem:[%s1020_s22 + $0x140] sm:$0xff]  ;;  %834 = vst.msk [vmem:[%s1025_s25 + $0x238] sm:$0xff] %vm798_vm0, %v769_v36 }
  0x24   : > { %835 = vst.msk [vmem:[%s1025_s25 + $0x248] sm:$0xff] %vm798_vm0, %v770_v37  ;;  %836 = vst.msk [vmem:[%s1025_s25 + $0x258] sm:$0xff] %vm798_vm0, %v771_v38  ;;  %v775_v42 = vld [vmem:[%s1020_s22 + $0x148] sm:$0xff]  ;;  %v776_v43 = vld [vmem:[%s1020_s22 + $0x150] sm:$0xff] }
  0x25   : > { %v777_v44 = vld [vmem:[%s1020_s22 + $0x158] sm:$0xff]  ;;  %837 = vst.msk [vmem:[%s1025_s25 + $0x268] sm:$0xff] %vm798_vm0, %v772_v39  ;;  %838 = vst.msk [vmem:[%s1025_s25 + $0x278] sm:$0xff] %vm798_vm0, %v773_v40  ;;  %v778_v45 = vld [vmem:[%s1020_s22 + $0x160] sm:$0xff] }
  0x26   : > { %839 = vst.msk [vmem:[%s1025_s25 + $0x288] sm:$0xff] %vm798_vm0, %v774_v41  ;;  %v779_v46 = vld [vmem:[%s1020_s22 + $0x168] sm:$0xff]  ;;  %v780_v47 = vld [vmem:[%s1020_s22 + $0x170] sm:$0xff]  ;;  %840 = vst.msk [vmem:[%s1025_s25 + $0x298] sm:$0xff] %vm798_vm0, %v775_v42 }
  0x27   : > { %841 = vst.msk [vmem:[%s1025_s25 + $0x2a8] sm:$0xff] %vm798_vm0, %v776_v43  ;;  %842 = vst.msk [vmem:[%s1025_s25 + $0x2b8] sm:$0xff] %vm798_vm0, %v777_v44  ;;  %v781_v48 = vld [vmem:[%s1020_s22 + $0x178] sm:$0xff]  ;;  %v782_v49 = vld [vmem:[%s1020_s22 + $0x180] sm:$0xff] }
  0x28   : > { %v783_v50 = vld [vmem:[%s1020_s22 + $0x188] sm:$0xff]  ;;  %843 = vst.msk [vmem:[%s1025_s25 + $0x2c8] sm:$0xff] %vm798_vm0, %v778_v45  ;;  %844 = vst.msk [vmem:[%s1025_s25 + $0x2d8] sm:$0xff] %vm798_vm0, %v779_v46  ;;  %v784_v51 = vld [vmem:[%s1020_s22 + $0x190] sm:$0xff] }
  0x29   : > { %845 = vst.msk [vmem:[%s1025_s25 + $0x2e8] sm:$0xff] %vm798_vm0, %v780_v47  ;;  %v785_v52 = vld [vmem:[%s1020_s22 + $0x198] sm:$0xff]  ;;  %v786_v53 = vld [vmem:[%s1020_s22 + $0x1a0] sm:$0xff]  ;;  %846 = vst.msk [vmem:[%s1025_s25 + $0x2f8] sm:$0xff] %vm798_vm0, %v781_v48 }
  0x2a   : > { %847 = vst.msk [vmem:[%s1025_s25 + $0x308] sm:$0xff] %vm798_vm0, %v782_v49  ;;  %848 = vst.msk [vmem:[%s1025_s25 + $0x318] sm:$0xff] %vm798_vm0, %v783_v50  ;;  %v787_v54 = vld [vmem:[%s1020_s22 + $0x1a8] sm:$0xff]  ;;  %v788_v55 = vld [vmem:[%s1020_s22 + $0x1b0] sm:$0xff] }
  0x2b   : > { %v789_v56 = vld [vmem:[%s1020_s22 + $0x1b8] sm:$0xff]  ;;  %849 = vst.msk [vmem:[%s1025_s25 + $0x328] sm:$0xff] %vm798_vm0, %v784_v51  ;;  %850 = vst.msk [vmem:[%s1025_s25 + $0x338] sm:$0xff] %vm798_vm0, %v785_v52  ;;  %v790_v57 = vld [vmem:[%s1020_s22 + $0x1c0] sm:$0xff] }
  0x2c   : > { %851 = vst.msk [vmem:[%s1025_s25 + $0x348] sm:$0xff] %vm798_vm0, %v786_v53  ;;  %v791_v58 = vld [vmem:[%s1020_s22 + $0x1c8] sm:$0xff]  ;;  %v792_v59 = vld [vmem:[%s1020_s22 + $0x1d0] sm:$0xff]  ;;  %852 = vst.msk [vmem:[%s1025_s25 + $0x358] sm:$0xff] %vm798_vm0, %v787_v54 }
  0x2d   : > { %853 = vst.msk [vmem:[%s1025_s25 + $0x368] sm:$0xff] %vm798_vm0, %v788_v55  ;;  %854 = vst.msk [vmem:[%s1025_s25 + $0x378] sm:$0xff] %vm798_vm0, %v789_v56  ;;  %v793_v60 = vld [vmem:[%s1020_s22 + $0x1d8] sm:$0xff]  ;;  %v794_v61 = vld [vmem:[%s1020_s22 + $0x1e0] sm:$0xff] }
  0x2e   : > { %v795_v62 = vld [vmem:[%s1020_s22 + $0x1e8] sm:$0xff]  ;;  %855 = vst.msk [vmem:[%s1025_s25 + $0x388] sm:$0xff] %vm798_vm0, %v790_v57  ;;  %856 = vst.msk [vmem:[%s1025_s25 + $0x398] sm:$0xff] %vm798_vm0, %v791_v58  ;;  %v796_v63 = vld [vmem:[%s1020_s22 + $0x1f0] sm:$0xff] }
  0x2f   : > { %857 = vst.msk [vmem:[%s1025_s25 + $0x3a8] sm:$0xff] %vm798_vm0, %v792_v59  ;;  %v797_v0 = vld [vmem:[%s1020_s22 + $0x1f8] sm:$0xff]  ;;  %858 = vst.msk [vmem:[%s1025_s25 + $0x3b8] sm:$0xff] %vm798_vm0, %v793_v60  ;;  %v349_v1 = vld [vmem:[%s1014_s19] sm:$0xff] }
  0x30   : > { %859 = vst.msk [vmem:[%s1025_s25 + $0x3c8] sm:$0xff] %vm798_vm0, %v794_v61  ;;  %860 = vst.msk [vmem:[%s1025_s25 + $0x3d8] sm:$0xff] %vm798_vm0, %v795_v62  ;;  %477 = vrot.lane.b32.xlu0 %v349_v1, %s979_s26  ;;  %v352_v2 = vld [vmem:[%s1014_s19 + $0x18] sm:$0xff] }
  0x31   : > { %861 = vst.msk [vmem:[%s1025_s25 + $0x3e8] sm:$0xff] %vm798_vm0, %v796_v63  ;;  %862 = vst.msk [vmem:[%s1025_s25 + $0x3f8] sm:$0xff] %vm798_vm0, %v797_v0  ;;  %483 = vrot.lane.b32.xlu1 %v352_v2, %s979_s26  ;;  %v350_v3 = vld [vmem:[%s1014_s19 + $0x8] sm:$0xff] }
  0x32   : > { %v354_v4 = vld [vmem:[%s1014_s19 + $0x28] sm:$0xff]  ;;  %v353_v5 = vld [vmem:[%s1014_s19 + $0x20] sm:$0xff]  ;;  %v356_v6 = vld [vmem:[%s1014_s19 + $0x38] sm:$0xff] }
  0x33   : > { %v355_v7 = vld [vmem:[%s1014_s19 + $0x30] sm:$0xff]  ;;  %v358_v8 = vld [vmem:[%s1014_s19 + $0x48] sm:$0xff]  ;;  %v357_v9 = vld [vmem:[%s1014_s19 + $0x40] sm:$0xff] }
  0x34   : > { %479 = vrot.lane.b32.xlu0 %v350_v3, %s979_s26  ;;  %v360_v10 = vld [vmem:[%s1014_s19 + $0x58] sm:$0xff]  ;;  %v359_v11 = vld [vmem:[%s1014_s19 + $0x50] sm:$0xff]  ;;  %v362_v12 = vld [vmem:[%s1014_s19 + $0x68] sm:$0xff] }
  0x35   : > { %487 = vrot.lane.b32.xlu1 %v354_v4, %s979_s26  ;;  %v222_v13 = vld [vmem:[%s1243_s29 + $0x10] sm:$0xff]  ;;  %v220_v14 = vld [vmem:[%s1243_s29] sm:$0xff]  ;;  %v223_v15 = vld [vmem:[%s1243_s29 + $0x18] sm:$0xff] }
  0x36   : > { %287 = vst.msk [vmem:[%s1025_s25 + $0x20] sm:$0xff] %vm284_vm1, %v222_v13  ;;  %285 = vst.msk [vmem:[%s1025_s25] sm:$0xff] %vm284_vm1, %v220_v14  ;;  %v221_v16 = vld [vmem:[%s1243_s29 + $0x8] sm:$0xff]  ;;  %v361_v17 = vld [vmem:[%s1014_s19 + $0x60] sm:$0xff] }
  0x37   : > { %288 = vst.msk [vmem:[%s1025_s25 + $0x30] sm:$0xff] %vm284_vm1, %v223_v15  ;;  %286 = vst.msk [vmem:[%s1025_s25 + $0x10] sm:$0xff] %vm284_vm1, %v221_v16  ;;  %v225_v18 = vld [vmem:[%s1243_s29 + $0x28] sm:$0xff]  ;;  %v224_v19 = vld [vmem:[%s1243_s29 + $0x20] sm:$0xff] }
  0x38   : > { %485 = vrot.lane.b32.xlu0 %v353_v5, %s979_s26  ;;  %v364_v20 = vld [vmem:[%s1014_s19 + $0x78] sm:$0xff]  ;;  %290 = vst.msk [vmem:[%s1025_s25 + $0x50] sm:$0xff] %vm284_vm1, %v225_v18  ;;  %289 = vst.msk [vmem:[%s1025_s25 + $0x40] sm:$0xff] %vm284_vm1, %v224_v19 }
  0x39   : > { %491 = vrot.lane.b32.xlu1 %v356_v6, %s979_s26  ;;  %v227_v21 = vld [vmem:[%s1243_s29 + $0x38] sm:$0xff]  ;;  %v363_v22 = vld [vmem:[%s1014_s19 + $0x70] sm:$0xff]  ;;  %v229_v24 = vld [vmem:[%s1243_s29 + $0x48] sm:$0xff] }
  0x3a   : > { %292 = vst.msk [vmem:[%s1025_s25 + $0x70] sm:$0xff] %vm284_vm1, %v227_v21  ;;  %v226_v23 = vld [vmem:[%s1243_s29 + $0x30] sm:$0xff]  ;;  %v228_v25 = vld [vmem:[%s1243_s29 + $0x40] sm:$0xff]  ;;  %v366_v26 = vld [vmem:[%s1014_s19 + $0x88] sm:$0xff] }
  0x3b   : > { %291 = vst.msk [vmem:[%s1025_s25 + $0x60] sm:$0xff] %vm284_vm1, %v226_v23  ;;  %294 = vst.msk [vmem:[%s1025_s25 + $0x90] sm:$0xff] %vm284_vm1, %v229_v24  ;;  %v231_v27 = vld [vmem:[%s1243_s29 + $0x58] sm:$0xff]  ;;  %v230_v28 = vld [vmem:[%s1243_s29 + $0x50] sm:$0xff] }
  0x3c   : > { %489 = vrot.lane.b32.xlu0 %v355_v7, %s979_s26  ;;  %293 = vst.msk [vmem:[%s1025_s25 + $0x80] sm:$0xff] %vm284_vm1, %v228_v25  ;;  %v233_v29 = vld [vmem:[%s1243_s29 + $0x68] sm:$0xff]  ;;  %296 = vst.msk [vmem:[%s1025_s25 + $0xb0] sm:$0xff] %vm284_vm1, %v231_v27 }
  0x3d   : > { %495 = vrot.lane.b32.xlu1 %v358_v8, %s979_s26  ;;  %295 = vst.msk [vmem:[%s1025_s25 + $0xa0] sm:$0xff] %vm284_vm1, %v230_v28  ;;  %298 = vst.msk [vmem:[%s1025_s25 + $0xd0] sm:$0xff] %vm284_vm1, %v233_v29  ;;  %v232_v30 = vld [vmem:[%s1243_s29 + $0x60] sm:$0xff] }
  0x3e   : > { %v235_v31 = vld [vmem:[%s1243_s29 + $0x78] sm:$0xff]  ;;  %v234_v32 = vld [vmem:[%s1243_s29 + $0x70] sm:$0xff]  ;;  %297 = vst.msk [vmem:[%s1025_s25 + $0xc0] sm:$0xff] %vm284_vm1, %v232_v30  ;;  %v237_v33 = vld [vmem:[%s1243_s29 + $0x88] sm:$0xff] }
  0x3f   : > { %300 = vst.msk [vmem:[%s1025_s25 + $0xf0] sm:$0xff] %vm284_vm1, %v235_v31  ;;  %299 = vst.msk [vmem:[%s1025_s25 + $0xe0] sm:$0xff] %vm284_vm1, %v234_v32  ;;  %v236_v34 = vld [vmem:[%s1243_s29 + $0x80] sm:$0xff]  ;;  %v239_v35 = vld [vmem:[%s1243_s29 + $0x98] sm:$0xff] }
  0x40   : > { %493 = vrot.lane.b32.xlu0 %v357_v9, %s979_s26  ;;  %302 = vst.msk [vmem:[%s1025_s25 + $0x110] sm:$0xff] %vm284_vm1, %v237_v33  ;;  %301 = vst.msk [vmem:[%s1025_s25 + $0x100] sm:$0xff] %vm284_vm1, %v236_v34  ;;  %v238_v36 = vld [vmem:[%s1243_s29 + $0x90] sm:$0xff] }
  0x41   : > { %499 = vrot.lane.b32.xlu1 %v360_v10, %s979_s26  ;;  %304 = vst.msk [vmem:[%s1025_s25 + $0x130] sm:$0xff] %vm284_vm1, %v239_v35  ;;  %v241_v37 = vld [vmem:[%s1243_s29 + $0xa8] sm:$0xff]  ;;  %v240_v38 = vld [vmem:[%s1243_s29 + $0xa0] sm:$0xff] }
  0x42   : > { %303 = vst.msk [vmem:[%s1025_s25 + $0x120] sm:$0xff] %vm284_vm1, %v238_v36  ;;  %306 = vst.msk [vmem:[%s1025_s25 + $0x150] sm:$0xff] %vm284_vm1, %v241_v37  ;;  %v243_v39 = vld [vmem:[%s1243_s29 + $0xb8] sm:$0xff]  ;;  %v365_v40 = vld [vmem:[%s1014_s19 + $0x80] sm:$0xff] }
  0x43   : > { %305 = vst.msk [vmem:[%s1025_s25 + $0x140] sm:$0xff] %vm284_vm1, %v240_v38  ;;  %308 = vst.msk [vmem:[%s1025_s25 + $0x170] sm:$0xff] %vm284_vm1, %v243_v39  ;;  %v242_v41 = vld [vmem:[%s1243_s29 + $0xb0] sm:$0xff]  ;;  %v368_v42 = vld [vmem:[%s1014_s19 + $0x98] sm:$0xff] }
  0x44   : > { %497 = vrot.lane.b32.xlu0 %v359_v11, %s979_s26  ;;  %307 = vst.msk [vmem:[%s1025_s25 + $0x160] sm:$0xff] %vm284_vm1, %v242_v41  ;;  %v245_v43 = vld [vmem:[%s1243_s29 + $0xc8] sm:$0xff]  ;;  %v367_v44 = vld [vmem:[%s1014_s19 + $0x90] sm:$0xff] }
  0x45   : > { %503 = vrot.lane.b32.xlu1 %v362_v12, %s979_s26  ;;  %310 = vst.msk [vmem:[%s1025_s25 + $0x190] sm:$0xff] %vm284_vm1, %v245_v43  ;;  %v244_v45 = vld [vmem:[%s1243_s29 + $0xc0] sm:$0xff]  ;;  %v370_v46 = vld [vmem:[%s1014_s19 + $0xa8] sm:$0xff] }
  0x46   : > { %309 = vst.msk [vmem:[%s1025_s25 + $0x180] sm:$0xff] %vm284_vm1, %v244_v45  ;;  %v247_v47 = vld [vmem:[%s1243_s29 + $0xd8] sm:$0xff]  ;;  %v369_v48 = vld [vmem:[%s1014_s19 + $0xa0] sm:$0xff]  ;;  %v246_v49 = vld [vmem:[%s1243_s29 + $0xd0] sm:$0xff] }
  0x47   : > { %312 = vst.msk [vmem:[%s1025_s25 + $0x1b0] sm:$0xff] %vm284_vm1, %v247_v47  ;;  %v372_v50 = vld [vmem:[%s1014_s19 + $0xb8] sm:$0xff]  ;;  %311 = vst.msk [vmem:[%s1025_s25 + $0x1a0] sm:$0xff] %vm284_vm1, %v246_v49  ;;  %v249_v51 = vld [vmem:[%s1243_s29 + $0xe8] sm:$0xff] }
  0x48   : > { %501 = vrot.lane.b32.xlu0 %v361_v17, %s979_s26  ;;  %314 = vst.msk [vmem:[%s1025_s25 + $0x1d0] sm:$0xff] %vm284_vm1, %v249_v51  ;;  %v371_v52 = vld [vmem:[%s1014_s19 + $0xb0] sm:$0xff]  ;;  %v248_v53 = vld [vmem:[%s1243_s29 + $0xe0] sm:$0xff] }
  0x49   : > { %507 = vrot.lane.b32.xlu1 %v364_v20, %s979_s26  ;;  %v374_v54 = vld [vmem:[%s1014_s19 + $0xc8] sm:$0xff]  ;;  %313 = vst.msk [vmem:[%s1025_s25 + $0x1c0] sm:$0xff] %vm284_vm1, %v248_v53  ;;  %v251_v55 = vld [vmem:[%s1243_s29 + $0xf8] sm:$0xff] }
  0x4a   : > { %316 = vst.msk [vmem:[%s1025_s25 + $0x1f0] sm:$0xff] %vm284_vm1, %v251_v55  ;;  %v373_v56 = vld [vmem:[%s1014_s19 + $0xc0] sm:$0xff]  ;;  %v250_v57 = vld [vmem:[%s1243_s29 + $0xf0] sm:$0xff]  ;;  %v376_v58 = vld [vmem:[%s1014_s19 + $0xd8] sm:$0xff] }
  0x4b   : > { %315 = vst.msk [vmem:[%s1025_s25 + $0x1e0] sm:$0xff] %vm284_vm1, %v250_v57  ;;  %v253_v59 = vld [vmem:[%s1243_s29 + $0x108] sm:$0xff]  ;;  %v375_v60 = vld [vmem:[%s1014_s19 + $0xd0] sm:$0xff]  ;;  %v252_v61 = vld [vmem:[%s1243_s29 + $0x100] sm:$0xff] }
  0x4c   : > { %505 = vrot.lane.b32.xlu0 %v363_v22, %s979_s26  ;;  %318 = vst.msk [vmem:[%s1025_s25 + $0x210] sm:$0xff] %vm284_vm1, %v253_v59  ;;  %v378_v62 = vld [vmem:[%s1014_s19 + $0xe8] sm:$0xff]  ;;  %317 = vst.msk [vmem:[%s1025_s25 + $0x200] sm:$0xff] %vm284_vm1, %v252_v61 }
  0x4d   : > { %511 = vrot.lane.b32.xlu1 %v366_v26, %s979_s26  ;;  %v255_v63 = vld [vmem:[%s1243_s29 + $0x118] sm:$0xff]  ;;  %v377_v0 = vld [vmem:[%s1014_s19 + $0xe0] sm:$0xff]  ;;  %v254_v1 = vld [vmem:[%s1243_s29 + $0x110] sm:$0xff] }
  0x4e   : > { %320 = vst.msk [vmem:[%s1025_s25 + $0x230] sm:$0xff] %vm284_vm1, %v255_v63  ;;  %v380_v2 = vld [vmem:[%s1014_s19 + $0xf8] sm:$0xff]  ;;  %319 = vst.msk [vmem:[%s1025_s25 + $0x220] sm:$0xff] %vm284_vm1, %v254_v1  ;;  %v257_v3 = vld [vmem:[%s1243_s29 + $0x128] sm:$0xff] }
  0x4f   : > { %322 = vst.msk [vmem:[%s1025_s25 + $0x250] sm:$0xff] %vm284_vm1, %v257_v3  ;;  %v379_v4 = vld [vmem:[%s1014_s19 + $0xf0] sm:$0xff]  ;;  %v256_v5 = vld [vmem:[%s1243_s29 + $0x120] sm:$0xff]  ;;  %v382_v6 = vld [vmem:[%s1014_s19 + $0x108] sm:$0xff] }
  0x50   : > { %509 = vrot.lane.b32.xlu0 %v365_v40, %s979_s26  ;;  %321 = vst.msk [vmem:[%s1025_s25 + $0x240] sm:$0xff] %vm284_vm1, %v256_v5  ;;  %v259_v7 = vld [vmem:[%s1243_s29 + $0x138] sm:$0xff]  ;;  %v381_v8 = vld [vmem:[%s1014_s19 + $0x100] sm:$0xff] }
  0x51   : > { %515 = vrot.lane.b32.xlu1 %v368_v42, %s979_s26  ;;  %324 = vst.msk [vmem:[%s1025_s25 + $0x270] sm:$0xff] %vm284_vm1, %v259_v7  ;;  %v258_v9 = vld [vmem:[%s1243_s29 + $0x130] sm:$0xff]  ;;  %v384_v10 = vld [vmem:[%s1014_s19 + $0x118] sm:$0xff] }
  0x52   : > { %323 = vst.msk [vmem:[%s1025_s25 + $0x260] sm:$0xff] %vm284_vm1, %v258_v9  ;;  %v261_v11 = vld [vmem:[%s1243_s29 + $0x148] sm:$0xff]  ;;  %v383_v12 = vld [vmem:[%s1014_s19 + $0x110] sm:$0xff]  ;;  %v260_v13 = vld [vmem:[%s1243_s29 + $0x140] sm:$0xff] }
  0x53   : > { %326 = vst.msk [vmem:[%s1025_s25 + $0x290] sm:$0xff] %vm284_vm1, %v261_v11  ;;  %v386_v14 = vld [vmem:[%s1014_s19 + $0x128] sm:$0xff]  ;;  %325 = vst.msk [vmem:[%s1025_s25 + $0x280] sm:$0xff] %vm284_vm1, %v260_v13  ;;  %v263_v15 = vld [vmem:[%s1243_s29 + $0x158] sm:$0xff] }
  0x54   : > { %513 = vrot.lane.b32.xlu0 %v367_v44, %s979_s26  ;;  %328 = vst.msk [vmem:[%s1025_s25 + $0x2b0] sm:$0xff] %vm284_vm1, %v263_v15  ;;  %v385_v16 = vld [vmem:[%s1014_s19 + $0x120] sm:$0xff]  ;;  %v262_v17 = vld [vmem:[%s1243_s29 + $0x150] sm:$0xff] }
  0x55   : > { %519 = vrot.lane.b32.xlu1 %v370_v46, %s979_s26  ;;  %v388_v18 = vld [vmem:[%s1014_s19 + $0x138] sm:$0xff]  ;;  %327 = vst.msk [vmem:[%s1025_s25 + $0x2a0] sm:$0xff] %vm284_vm1, %v262_v17  ;;  %v265_v19 = vld [vmem:[%s1243_s29 + $0x168] sm:$0xff] }
  0x56   : > { %330 = vst.msk [vmem:[%s1025_s25 + $0x2d0] sm:$0xff] %vm284_vm1, %v265_v19  ;;  %v387_v20 = vld [vmem:[%s1014_s19 + $0x130] sm:$0xff]  ;;  %v264_v21 = vld [vmem:[%s1243_s29 + $0x160] sm:$0xff]  ;;  %v390_v22 = vld [vmem:[%s1014_s19 + $0x148] sm:$0xff] }
  0x57   : > { %329 = vst.msk [vmem:[%s1025_s25 + $0x2c0] sm:$0xff] %vm284_vm1, %v264_v21  ;;  %v267_v23 = vld [vmem:[%s1243_s29 + $0x178] sm:$0xff]  ;;  %v389_v24 = vld [vmem:[%s1014_s19 + $0x140] sm:$0xff]  ;;  %v266_v25 = vld [vmem:[%s1243_s29 + $0x170] sm:$0xff] }
  0x58   : > { %517 = vrot.lane.b32.xlu0 %v369_v48, %s979_s26  ;;  %332 = vst.msk [vmem:[%s1025_s25 + $0x2f0] sm:$0xff] %vm284_vm1, %v267_v23  ;;  %v392_v26 = vld [vmem:[%s1014_s19 + $0x158] sm:$0xff]  ;;  %331 = vst.msk [vmem:[%s1025_s25 + $0x2e0] sm:$0xff] %vm284_vm1, %v266_v25 }
  0x59   : > { %523 = vrot.lane.b32.xlu1 %v372_v50, %s979_s26  ;;  %v269_v27 = vld [vmem:[%s1243_s29 + $0x188] sm:$0xff]  ;;  %v391_v28 = vld [vmem:[%s1014_s19 + $0x150] sm:$0xff]  ;;  %v268_v29 = vld [vmem:[%s1243_s29 + $0x180] sm:$0xff] }
  0x5a   : > { %334 = vst.msk [vmem:[%s1025_s25 + $0x310] sm:$0xff] %vm284_vm1, %v269_v27  ;;  %v394_v30 = vld [vmem:[%s1014_s19 + $0x168] sm:$0xff]  ;;  %333 = vst.msk [vmem:[%s1025_s25 + $0x300] sm:$0xff] %vm284_vm1, %v268_v29  ;;  %v271_v31 = vld [vmem:[%s1243_s29 + $0x198] sm:$0xff] }
  0x5b   : > { %336 = vst.msk [vmem:[%s1025_s25 + $0x330] sm:$0xff] %vm284_vm1, %v271_v31  ;;  %v393_v32 = vld [vmem:[%s1014_s19 + $0x160] sm:$0xff]  ;;  %v270_v33 = vld [vmem:[%s1243_s29 + $0x190] sm:$0xff]  ;;  %v396_v34 = vld [vmem:[%s1014_s19 + $0x178] sm:$0xff] }
  0x5c   : > { %521 = vrot.lane.b32.xlu0 %v371_v52, %s979_s26  ;;  %335 = vst.msk [vmem:[%s1025_s25 + $0x320] sm:$0xff] %vm284_vm1, %v270_v33  ;;  %v273_v35 = vld [vmem:[%s1243_s29 + $0x1a8] sm:$0xff]  ;;  %v395_v36 = vld [vmem:[%s1014_s19 + $0x170] sm:$0xff] }
  0x5d   : > { %527 = vrot.lane.b32.xlu1 %v374_v54, %s979_s26  ;;  %338 = vst.msk [vmem:[%s1025_s25 + $0x350] sm:$0xff] %vm284_vm1, %v273_v35  ;;  %v272_v37 = vld [vmem:[%s1243_s29 + $0x1a0] sm:$0xff]  ;;  %v398_v38 = vld [vmem:[%s1014_s19 + $0x188] sm:$0xff] }
  0x5e   : > { %337 = vst.msk [vmem:[%s1025_s25 + $0x340] sm:$0xff] %vm284_vm1, %v272_v37  ;;  %v275_v39 = vld [vmem:[%s1243_s29 + $0x1b8] sm:$0xff]  ;;  %v397_v40 = vld [vmem:[%s1014_s19 + $0x180] sm:$0xff]  ;;  %v274_v42 = vld [vmem:[%s1243_s29 + $0x1b0] sm:$0xff] }
  0x5f   : > { %340 = vst.msk [vmem:[%s1025_s25 + $0x370] sm:$0xff] %vm284_vm1, %v275_v39  ;;  %v400_v43 = vld [vmem:[%s1014_s19 + $0x198] sm:$0xff]  ;;  %339 = vst.msk [vmem:[%s1025_s25 + $0x360] sm:$0xff] %vm284_vm1, %v274_v42  ;;  %v277_v44 = vld [vmem:[%s1243_s29 + $0x1c8] sm:$0xff] }
  0x60   : > { %525 = vrot.lane.b32.xlu0 %v373_v56, %s979_s26  ;;  %342 = vst.msk [vmem:[%s1025_s25 + $0x390] sm:$0xff] %vm284_vm1, %v277_v44  ;;  %v399_v45 = vld [vmem:[%s1014_s19 + $0x190] sm:$0xff]  ;;  %v276_v46 = vld [vmem:[%s1243_s29 + $0x1c0] sm:$0xff] }
  0x61   : > { %531 = vrot.lane.b32.xlu1 %v376_v58, %s979_s26  ;;  %v402_v47 = vld [vmem:[%s1014_s19 + $0x1a8] sm:$0xff]  ;;  %341 = vst.msk [vmem:[%s1025_s25 + $0x380] sm:$0xff] %vm284_vm1, %v276_v46  ;;  %v279_v48 = vld [vmem:[%s1243_s29 + $0x1d8] sm:$0xff] }
  0x62   : > { %344 = vst.msk [vmem:[%s1025_s25 + $0x3b0] sm:$0xff] %vm284_vm1, %v279_v48  ;;  %v401_v49 = vld [vmem:[%s1014_s19 + $0x1a0] sm:$0xff]  ;;  %v278_v50 = vld [vmem:[%s1243_s29 + $0x1d0] sm:$0xff]  ;;  %v404_v51 = vld [vmem:[%s1014_s19 + $0x1b8] sm:$0xff] }
  0x63   : > { %343 = vst.msk [vmem:[%s1025_s25 + $0x3a0] sm:$0xff] %vm284_vm1, %v278_v50  ;;  %v281_v52 = vld [vmem:[%s1243_s29 + $0x1e8] sm:$0xff]  ;;  %v403_v53 = vld [vmem:[%s1014_s19 + $0x1b0] sm:$0xff]  ;;  %v280_v54 = vld [vmem:[%s1243_s29 + $0x1e0] sm:$0xff] }
  0x64   : > { %529 = vrot.lane.b32.xlu0 %v375_v60, %s979_s26  ;;  %346 = vst.msk [vmem:[%s1025_s25 + $0x3d0] sm:$0xff] %vm284_vm1, %v281_v52  ;;  %v406_v55 = vld [vmem:[%s1014_s19 + $0x1c8] sm:$0xff]  ;;  %345 = vst.msk [vmem:[%s1025_s25 + $0x3c0] sm:$0xff] %vm284_vm1, %v280_v54 }
  0x65   : > { %535 = vrot.lane.b32.xlu1 %v378_v62, %s979_s26  ;;  %v283_v56 = vld [vmem:[%s1243_s29 + $0x1f8] sm:$0xff]  ;;  %v405_v57 = vld [vmem:[%s1014_s19 + $0x1c0] sm:$0xff]  ;;  %v282_v58 = vld [vmem:[%s1243_s29 + $0x1f0] sm:$0xff] }
  0x66   : > { %348 = vst.msk [vmem:[%s1025_s25 + $0x3f0] sm:$0xff] %vm284_vm1, %v283_v56  ;;  %v408_v59 = vld [vmem:[%s1014_s19 + $0x1d8] sm:$0xff]  ;;  %347 = vst.msk [vmem:[%s1025_s25 + $0x3e0] sm:$0xff] %vm284_vm1, %v282_v58  ;;  %v407_v60 = vld [vmem:[%s1014_s19 + $0x1d0] sm:$0xff] }
  0x67   : > { %v410_v62 = vld [vmem:[%s1014_s19 + $0x1e8] sm:$0xff] }
  0x68   : > { %533 = vrot.lane.b32.xlu0 %v377_v0, %s979_s26  ;;  %v409_v0 = vld [vmem:[%s1014_s19 + $0x1e0] sm:$0xff] }
  0x69   : > { %539 = vrot.lane.b32.xlu1 %v380_v2, %s979_s26  ;;  %v412_v2 = vld [vmem:[%s1014_s19 + $0x1f8] sm:$0xff] }
  0x6c   : > { %537 = vrot.lane.b32.xlu0 %v379_v4, %s979_s26  ;;  %v411_v4 = vld [vmem:[%s1014_s19 + $0x1f0] sm:$0xff] }
  0x6d   : > { %543 = vrot.lane.b32.xlu1 %v382_v6, %s979_s26 }
  0x70   : > { %541 = vrot.lane.b32.xlu0 %v381_v8, %s979_s26 }
  0x71   : > { %547 = vrot.lane.b32.xlu1 %v384_v10, %s979_s26 }
  0x74   : > { %545 = vrot.lane.b32.xlu0 %v383_v12, %s979_s26 }
  0x75   : > { %551 = vrot.lane.b32.xlu1 %v386_v14, %s979_s26 }
  0x78   : > { %549 = vrot.lane.b32.xlu0 %v385_v16, %s979_s26 }
  0x79   : > { %555 = vrot.lane.b32.xlu1 %v388_v18, %s979_s26 }
  0x7c   : > { %553 = vrot.lane.b32.xlu0 %v387_v20, %s979_s26 }
  0x7d   : > { %559 = vrot.lane.b32.xlu1 %v390_v22, %s979_s26 }
  0x80   : > { %557 = vrot.lane.b32.xlu0 %v389_v24, %s979_s26 }
  0x81   : > { %563 = vrot.lane.b32.xlu1 %v392_v26, %s979_s26 }
  0x84   : > { %561 = vrot.lane.b32.xlu0 %v391_v28, %s979_s26  ;;  %v482_v41 = vpop.permute.xlu1 %481 }
  0x85   : > { %567 = vrot.lane.b32.xlu1 %v394_v30, %s979_s26  ;;  %672 = vst.msk [vmem:[%s1025_s25 + $0x20] sm:$0xff] %vm669_vm2, %v482_v41 }
  0x88   : > { %565 = vrot.lane.b32.xlu0 %v393_v32, %s979_s26 }
  0x89   : > { %571 = vrot.lane.b32.xlu1 %v396_v34, %s979_s26 }
  0x8c   : > { %569 = vrot.lane.b32.xlu0 %v395_v36, %s979_s26 }
  0x8d   : > { %575 = vrot.lane.b32.xlu1 %v398_v38, %s979_s26 }
  0x90   : > { %573 = vrot.lane.b32.xlu0 %v397_v40, %s979_s26 }
  0x91   : > { %579 = vrot.lane.b32.xlu1 %v400_v43, %s979_s26 }
  0x94   : > { %577 = vrot.lane.b32.xlu0 %v399_v45, %s979_s26 }
  0x95   : > { %583 = vrot.lane.b32.xlu1 %v402_v47, %s979_s26 }
  0x98   : > { %581 = vrot.lane.b32.xlu0 %v401_v49, %s979_s26 }
  0x99   : > { %587 = vrot.lane.b32.xlu1 %v404_v51, %s979_s26 }
  0x9c   : > { %585 = vrot.lane.b32.xlu0 %v403_v53, %s979_s26 }
  0x9d   : > { %591 = vrot.lane.b32.xlu1 %v406_v55, %s979_s26 }
  0xa0   : > { %589 = vrot.lane.b32.xlu0 %v405_v57, %s979_s26 }
  0xa1   : > { %595 = vrot.lane.b32.xlu1 %v408_v59, %s979_s26 }
  0xa2   : > { %v478_v61 = vpop.permute.xlu0 %477 }
  0xa3   : > { %670 = vst.msk [vmem:[%s1025_s25] sm:$0xff] %vm669_vm2, %v478_v61  ;;  %v484_v63 = vpop.permute.xlu1 %483 }
  0xa4   : > { %593 = vrot.lane.b32.xlu0 %v407_v60, %s979_s26  ;;  %673 = vst.msk [vmem:[%s1025_s25 + $0x30] sm:$0xff] %vm669_vm2, %v484_v63 }
  0xa5   : > { %599 = vrot.lane.b32.xlu1 %v410_v62, %s979_s26 }
  0xa6   : > { %v480_v1 = vpop.permute.xlu0 %479 }
  0xa7   : > { %671 = vst.msk [vmem:[%s1025_s25 + $0x10] sm:$0xff] %vm669_vm2, %v480_v1  ;;  %v488_v3 = vpop.permute.xlu1 %487 }
  0xa8   : > { %597 = vrot.lane.b32.xlu0 %v409_v0, %s979_s26  ;;  %675 = vst.msk [vmem:[%s1025_s25 + $0x50] sm:$0xff] %vm669_vm2, %v488_v3 }
  0xa9   : > { %603 = vrot.lane.b32.xlu1 %v412_v2, %s979_s26 }
  0xaa   : > { %v486_v5 = vpop.permute.xlu0 %485 }
  0xab   : > { %674 = vst.msk [vmem:[%s1025_s25 + $0x40] sm:$0xff] %vm669_vm2, %v486_v5  ;;  %v492_v6 = vpop.permute.xlu1 %491 }
  0xac   : > { %601 = vrot.lane.b32.xlu0 %v411_v4, %s979_s26  ;;  %677 = vst.msk [vmem:[%s1025_s25 + $0x70] sm:$0xff] %vm669_vm2, %v492_v6 }
  0xae   : > { %v490_v7 = vpop.permute.xlu0 %489 }
  0xaf   : > { %676 = vst.msk [vmem:[%s1025_s25 + $0x60] sm:$0xff] %vm669_vm2, %v490_v7  ;;  %v496_v8 = vpop.permute.xlu1 %495 }
  0xb0   : > { %679 = vst.msk [vmem:[%s1025_s25 + $0x90] sm:$0xff] %vm669_vm2, %v496_v8 }
  0xb2   : > { %v494_v9 = vpop.permute.xlu0 %493 }
  0xb3   : > { %678 = vst.msk [vmem:[%s1025_s25 + $0x80] sm:$0xff] %vm669_vm2, %v494_v9  ;;  %v500_v10 = vpop.permute.xlu1 %499 }
  0xb4   : > { %681 = vst.msk [vmem:[%s1025_s25 + $0xb0] sm:$0xff] %vm669_vm2, %v500_v10 }
  0xb6   : > { %v498_v11 = vpop.permute.xlu0 %497 }
  0xb7   : > { %680 = vst.msk [vmem:[%s1025_s25 + $0xa0] sm:$0xff] %vm669_vm2, %v498_v11  ;;  %v504_v12 = vpop.permute.xlu1 %503 }
  0xb8   : > { %683 = vst.msk [vmem:[%s1025_s25 + $0xd0] sm:$0xff] %vm669_vm2, %v504_v12 }
  0xba   : > { %v502_v13 = vpop.permute.xlu0 %501 }
  0xbb   : > { %682 = vst.msk [vmem:[%s1025_s25 + $0xc0] sm:$0xff] %vm669_vm2, %v502_v13  ;;  %v508_v14 = vpop.permute.xlu1 %507 }
  0xbc   : > { %685 = vst.msk [vmem:[%s1025_s25 + $0xf0] sm:$0xff] %vm669_vm2, %v508_v14 }
  0xbe   : > { %v506_v15 = vpop.permute.xlu0 %505 }
  0xbf   : > { %684 = vst.msk [vmem:[%s1025_s25 + $0xe0] sm:$0xff] %vm669_vm2, %v506_v15  ;;  %v512_v16 = vpop.permute.xlu1 %511 }
  0xc0   : > { %687 = vst.msk [vmem:[%s1025_s25 + $0x110] sm:$0xff] %vm669_vm2, %v512_v16 }
  0xc2   : > { %v510_v17 = vpop.permute.xlu0 %509 }
  0xc3   : > { %686 = vst.msk [vmem:[%s1025_s25 + $0x100] sm:$0xff] %vm669_vm2, %v510_v17  ;;  %v516_v18 = vpop.permute.xlu1 %515 }
  0xc4   : > { %689 = vst.msk [vmem:[%s1025_s25 + $0x130] sm:$0xff] %vm669_vm2, %v516_v18 }
  0xc6   : > { %v514_v19 = vpop.permute.xlu0 %513 }
  0xc7   : > { %688 = vst.msk [vmem:[%s1025_s25 + $0x120] sm:$0xff] %vm669_vm2, %v514_v19  ;;  %v520_v20 = vpop.permute.xlu1 %519 }
  0xc8   : > { %691 = vst.msk [vmem:[%s1025_s25 + $0x150] sm:$0xff] %vm669_vm2, %v520_v20 }
  0xca   : > { %v518_v21 = vpop.permute.xlu0 %517 }
  0xcb   : > { %690 = vst.msk [vmem:[%s1025_s25 + $0x140] sm:$0xff] %vm669_vm2, %v518_v21  ;;  %v524_v22 = vpop.permute.xlu1 %523 }
  0xcc   : > { %693 = vst.msk [vmem:[%s1025_s25 + $0x170] sm:$0xff] %vm669_vm2, %v524_v22 }
  0xce   : > { %v522_v23 = vpop.permute.xlu0 %521 }
  0xcf   : > { %692 = vst.msk [vmem:[%s1025_s25 + $0x160] sm:$0xff] %vm669_vm2, %v522_v23  ;;  %v528_v24 = vpop.permute.xlu1 %527 }
  0xd0   : > { %695 = vst.msk [vmem:[%s1025_s25 + $0x190] sm:$0xff] %vm669_vm2, %v528_v24 }
  0xd2   : > { %v526_v25 = vpop.permute.xlu0 %525 }
  0xd3   : > { %694 = vst.msk [vmem:[%s1025_s25 + $0x180] sm:$0xff] %vm669_vm2, %v526_v25  ;;  %v532_v26 = vpop.permute.xlu1 %531 }
  0xd4   : > { %697 = vst.msk [vmem:[%s1025_s25 + $0x1b0] sm:$0xff] %vm669_vm2, %v532_v26 }
  0xd6   : > { %v530_v27 = vpop.permute.xlu0 %529 }
  0xd7   : > { %696 = vst.msk [vmem:[%s1025_s25 + $0x1a0] sm:$0xff] %vm669_vm2, %v530_v27  ;;  %v536_v28 = vpop.permute.xlu1 %535 }
  0xd8   : > { %699 = vst.msk [vmem:[%s1025_s25 + $0x1d0] sm:$0xff] %vm669_vm2, %v536_v28 }
  0xda   : > { %v534_v29 = vpop.permute.xlu0 %533 }
  0xdb   : > { %698 = vst.msk [vmem:[%s1025_s25 + $0x1c0] sm:$0xff] %vm669_vm2, %v534_v29  ;;  %v540_v30 = vpop.permute.xlu1 %539 }
  0xdc   : > { %701 = vst.msk [vmem:[%s1025_s25 + $0x1f0] sm:$0xff] %vm669_vm2, %v540_v30 }
  0xde   : > { %v538_v31 = vpop.permute.xlu0 %537 }
  0xdf   : > { %700 = vst.msk [vmem:[%s1025_s25 + $0x1e0] sm:$0xff] %vm669_vm2, %v538_v31  ;;  %v544_v32 = vpop.permute.xlu1 %543 }
  0xe0   : > { %703 = vst.msk [vmem:[%s1025_s25 + $0x210] sm:$0xff] %vm669_vm2, %v544_v32 }
  0xe2   : > { %v542_v33 = vpop.permute.xlu0 %541 }
  0xe3   : > { %702 = vst.msk [vmem:[%s1025_s25 + $0x200] sm:$0xff] %vm669_vm2, %v542_v33  ;;  %v548_v34 = vpop.permute.xlu1 %547 }
  0xe4   : > { %705 = vst.msk [vmem:[%s1025_s25 + $0x230] sm:$0xff] %vm669_vm2, %v548_v34 }
  0xe6   : > { %v546_v35 = vpop.permute.xlu0 %545 }
  0xe7   : > { %704 = vst.msk [vmem:[%s1025_s25 + $0x220] sm:$0xff] %vm669_vm2, %v546_v35  ;;  %v552_v36 = vpop.permute.xlu1 %551 }
  0xe8   : > { %707 = vst.msk [vmem:[%s1025_s25 + $0x250] sm:$0xff] %vm669_vm2, %v552_v36 }
  0xea   : > { %v550_v37 = vpop.permute.xlu0 %549 }
  0xeb   : > { %706 = vst.msk [vmem:[%s1025_s25 + $0x240] sm:$0xff] %vm669_vm2, %v550_v37  ;;  %v556_v38 = vpop.permute.xlu1 %555 }
  0xec   : > { %709 = vst.msk [vmem:[%s1025_s25 + $0x270] sm:$0xff] %vm669_vm2, %v556_v38 }
  0xee   : > { %v554_v39 = vpop.permute.xlu0 %553 }
  0xef   : > { %708 = vst.msk [vmem:[%s1025_s25 + $0x260] sm:$0xff] %vm669_vm2, %v554_v39  ;;  %v560_v40 = vpop.permute.xlu1 %559 }
  0xf0   : > { %711 = vst.msk [vmem:[%s1025_s25 + $0x290] sm:$0xff] %vm669_vm2, %v560_v40 }
  0xf2   : > { %v558_v41 = vpop.permute.xlu0 %557 }
  0xf3   : > { %710 = vst.msk [vmem:[%s1025_s25 + $0x280] sm:$0xff] %vm669_vm2, %v558_v41  ;;  %v564_v42 = vpop.permute.xlu1 %563 }
  0xf4   : > { %713 = vst.msk [vmem:[%s1025_s25 + $0x2b0] sm:$0xff] %vm669_vm2, %v564_v42 }
  0xf6   : > { %v562_v43 = vpop.permute.xlu0 %561 }
  0xf7   : > { %712 = vst.msk [vmem:[%s1025_s25 + $0x2a0] sm:$0xff] %vm669_vm2, %v562_v43  ;;  %v568_v44 = vpop.permute.xlu1 %567 }
  0xf8   : > { %715 = vst.msk [vmem:[%s1025_s25 + $0x2d0] sm:$0xff] %vm669_vm2, %v568_v44 }
  0xfa   : > { %v566_v45 = vpop.permute.xlu0 %565 }
  0xfb   : > { %714 = vst.msk [vmem:[%s1025_s25 + $0x2c0] sm:$0xff] %vm669_vm2, %v566_v45  ;;  %v572_v46 = vpop.permute.xlu1 %571 }
  0xfc   : > { %717 = vst.msk [vmem:[%s1025_s25 + $0x2f0] sm:$0xff] %vm669_vm2, %v572_v46 }
  0xfe   : > { %v570_v47 = vpop.permute.xlu0 %569 }
  0xff   : > { %716 = vst.msk [vmem:[%s1025_s25 + $0x2e0] sm:$0xff] %vm669_vm2, %v570_v47  ;;  %v576_v48 = vpop.permute.xlu1 %575 }
 0x100   : > { %719 = vst.msk [vmem:[%s1025_s25 + $0x310] sm:$0xff] %vm669_vm2, %v576_v48 }
 0x102   : > { %v574_v49 = vpop.permute.xlu0 %573 }
 0x103   : > { %718 = vst.msk [vmem:[%s1025_s25 + $0x300] sm:$0xff] %vm669_vm2, %v574_v49  ;;  %v580_v50 = vpop.permute.xlu1 %579 }
 0x104   : > { %721 = vst.msk [vmem:[%s1025_s25 + $0x330] sm:$0xff] %vm669_vm2, %v580_v50 }
 0x106   : > { %v578_v51 = vpop.permute.xlu0 %577 }
 0x107   : > { %720 = vst.msk [vmem:[%s1025_s25 + $0x320] sm:$0xff] %vm669_vm2, %v578_v51  ;;  %v584_v52 = vpop.permute.xlu1 %583 }
 0x108   : > { %723 = vst.msk [vmem:[%s1025_s25 + $0x350] sm:$0xff] %vm669_vm2, %v584_v52 }
 0x10a   : > { %v582_v53 = vpop.permute.xlu0 %581 }
 0x10b   : > { %722 = vst.msk [vmem:[%s1025_s25 + $0x340] sm:$0xff] %vm669_vm2, %v582_v53  ;;  %v588_v54 = vpop.permute.xlu1 %587 }
 0x10c   : > { %725 = vst.msk [vmem:[%s1025_s25 + $0x370] sm:$0xff] %vm669_vm2, %v588_v54 }
 0x10e   : > { %v586_v55 = vpop.permute.xlu0 %585 }
 0x10f   : > { %724 = vst.msk [vmem:[%s1025_s25 + $0x360] sm:$0xff] %vm669_vm2, %v586_v55  ;;  %v592_v56 = vpop.permute.xlu1 %591 }
 0x110   : > { %727 = vst.msk [vmem:[%s1025_s25 + $0x390] sm:$0xff] %vm669_vm2, %v592_v56 }
 0x112   : > { %v590_v57 = vpop.permute.xlu0 %589 }
 0x113   : > { %726 = vst.msk [vmem:[%s1025_s25 + $0x380] sm:$0xff] %vm669_vm2, %v590_v57  ;;  %v596_v58 = vpop.permute.xlu1 %595 }
 0x114   : > { %729 = vst.msk [vmem:[%s1025_s25 + $0x3b0] sm:$0xff] %vm669_vm2, %v596_v58 }
 0x116   : > { %v594_v59 = vpop.permute.xlu0 %593 }
 0x117   : > { %728 = vst.msk [vmem:[%s1025_s25 + $0x3a0] sm:$0xff] %vm669_vm2, %v594_v59  ;;  %v600_v60 = vpop.permute.xlu1 %599 }
 0x118   : > { %731 = vst.msk [vmem:[%s1025_s25 + $0x3d0] sm:$0xff] %vm669_vm2, %v600_v60 }
 0x11a   : > { %v598_v61 = vpop.permute.xlu0 %597 }
 0x11b   : > { %730 = vst.msk [vmem:[%s1025_s25 + $0x3c0] sm:$0xff] %vm669_vm2, %v598_v61  ;;  %v604_v62 = vpop.permute.xlu1 %603 }
 0x11c   : > { %733 = vst.msk [vmem:[%s1025_s25 + $0x3f0] sm:$0xff] %vm669_vm2, %v604_v62 }
 0x11e   : > { %v602_v63 = vpop.permute.xlu0 %601 }
 0x11f   : > { %732 = vst.msk [vmem:[%s1025_s25 + $0x3e0] sm:$0xff] %vm669_vm2, %v602_v63 }
 0x120 PF: > { %s13_s12 = sadd.s32 1, %s977_s12  }
 0x121   : > { %p10_p4 = scmp.ge.s32.totalorder %s13_s12, 4  }
 0x123   :  { %12 = sbr.rel (!%p10_p4) target bundleno = 1 (0x1), region = 68 }

</bundles_post_ra>
